<compile_context>
chip_gen: v7x
topology: tpu7x:2x2x1
jax: 0.10.0
libtpu: 0.0.40
codegen_flags: <defaults>
</compile_context>

<pallas_src>
import functools

import jax
import jax.numpy as jnp
from jax.experimental import pallas as pl
from jax.experimental.pallas import tpu as pltpu

BN_EPS = 1e-5


def _round_up(a, b):
    return (a + b - 1) // b * b


def _vmem_limit_bytes():
    """~48 MiB on v7x (64 MiB physical VMEM), ~96 MiB on v5e/v6e (128 MiB)."""
    cap = 64 * 1024 * 1024
    try:
        cap = int(pltpu.get_tpu_info().vmem_capacity_bytes)
    except Exception:
        pass
    return min((cap * 3) // 4, 96 * 1024 * 1024)


# -----------------------------------------------------------------------------
# Fused path: Linear (MXU) + batch stats + BN + ReLU in one kernel.
# -----------------------------------------------------------------------------
def _fused_fc_bn_relu_kernel(x_ref, w_ref, g_ref, b_ref, o_ref,
                             acc_ref, s_ref, ss_ref, *, n_real, num_row_tiles):
    i = pl.program_id(1)            # N-tile index
    k = pl.program_id(2)            # Fin (reduction) tile index
    ni = pl.num_programs(1)
    nk = pl.num_programs(2)
    tm = acc_ref.shape[0]

    @pl.when(k == 0)
    def _():
        acc_ref[...] = jnp.zeros_like(acc_ref)

    @pl.when(jnp.logical_and(i == 0, k == 0))
    def _():
        s_ref[...] = jnp.zeros_like(s_ref)
        ss_ref[...] = jnp.zeros_like(ss_ref)

    # y_tile = x_tile @ W_tile.T : contract on the Fin axis of both operands
    # (W kept in PyTorch [Fout, Fin] layout); bf16 operands, f32 MXU accum.
    acc_ref[...] += jax.lax.dot_general(
        x_ref[...], w_ref[...],
        dimension_numbers=(((1,), (1,)), ((), ())),
        preferred_element_type=jnp.float32)

    @pl.when(k == nk - 1)
    def _():
        y = acc_ref[...]
        r0 = pl.multiple_of(i * tm, tm)
        # Stage this N-tile of y into the resident output slab.
        o_ref[pl.ds(r0, tm), :] = y.astype(o_ref.dtype)
        # Per-feature batch statistics from the f32 accumulator (XLU reduce).
        s_ref[...] += jnp.sum(y, axis=0, keepdims=True)
        ss_ref[...] += jnp.sum(y * y, axis=0, keepdims=True)

    @pl.when(jnp.logical_and(i == ni - 1, k == nk - 1))
    def _():
        inv_n = 1.0 / n_real
        mean = s_ref[...] * inv_n
        # One-pass biased variance; clamp guards fp cancellation.
        var = jnp.maximum(ss_ref[...] * inv_n - mean * mean, 0.0)
        scale = g_ref[...] * jax.lax.rsqrt(var + BN_EPS)      # rsqrt -> EUP slot
        shift = b_ref[...] - mean * scale

        # In-place BN + ReLU sweep over the VMEM slab, one row-tile at a time
        # (keeps intermediates at (tm, tn) instead of (n_p, tn)).
        @pl.loop(0, num_row_tiles)
        def _(ii):
            r0 = pl.multiple_of(ii * tm, tm)
            blk = o_ref[pl.ds(r0, tm), :].astype(jnp.float32)
            o_ref[pl.ds(r0, tm), :] = jnp.maximum(
                blk * scale + shift, 0.0).astype(o_ref.dtype)


# -----------------------------------------------------------------------------
# Fallback path (huge batch): matmul + stats kernel, then scale/shift+ReLU.
# -----------------------------------------------------------------------------
def _matmul_stats_kernel(x_ref, w_ref, y_ref, sum_ref, sumsq_ref, acc_ref):
    i = pl.program_id(1)
    k = pl.program_id(2)
    nk = pl.num_programs(2)

    @pl.when(k == 0)
    def _():
        acc_ref[...] = jnp.zeros_like(acc_ref)

    # sum/sumsq output blocks have index (0, j): resident across i and k,
    # so accumulate into them directly (no extra scratch / copy-out).
    @pl.when(jnp.logical_and(i == 0, k == 0))
    def _():
        sum_ref[...] = jnp.zeros_like(sum_ref)
        sumsq_ref[...] = jnp.zeros_like(sumsq_ref)

    acc_ref[...] += jax.lax.dot_general(
        x_ref[...], w_ref[...],
        dimension_numbers=(((1,), (1,)), ((), ())),
        preferred_element_type=jnp.float32)

    @pl.when(k == nk - 1)
    def _():
        y = acc_ref[...]
        y_ref[...] = y.astype(y_ref.dtype)   # narrow (bf16) writeback of y
        sum_ref[...] += jnp.sum(y, axis=0, keepdims=True)
        sumsq_ref[...] += jnp.sum(y * y, axis=0, keepdims=True)


def _scale_shift_relu_kernel(y_ref, scale_ref, shift_ref, o_ref):
    y = y_ref[...].astype(jnp.float32)
    o_ref[...] = jnp.maximum(
        y * scale_ref[...] + shift_ref[...], 0.0).astype(o_ref.dtype)


# -----------------------------------------------------------------------------
# Wrapper
# -----------------------------------------------------------------------------
def fc_block(x, weight, bias, gamma, beta, *, tm=512, tn=512, tk=512,
             mxu_dtype=jnp.bfloat16, fuse=None):
    """Forward of FC_block: ReLU(BatchNorm1d(Linear(x))), training-mode stats.

    x: [N, Fin]; weight: [Fout, Fin] (PyTorch layout); bias/gamma/beta: [Fout].
    `bias` is ignored inside the kernel: it is mathematically cancelled by the
    batch-mean subtraction of training-mode BatchNorm1d.
    """
    del bias  # exactly cancelled by BN's batch-mean subtraction

    n, f_in = x.shape
    f_out = weight.shape[0]
    out_dtype = x.dtype

    # ---- tile selection -----------------------------------------------------
    # bf16 operands need sublane multiples of 16; lanes multiples of 128.
    tm = _round_up(max(16, min(tm, _round_up(n, 16))), 16)
    tk = _round_up(max(128, min(tk, _round_up(f_in, 128))), 128)
    f_out_128 = _round_up(f_out, 128)
    # Keep >=2 blocks on the only "parallel" grid axis so both v7x cores work.
    tn_cap = max(128, (f_out_128 // 2) // 128 * 128) if f_out_128 >= 256 else 128
    tn = _round_up(max(128, min(tn, tn_cap)), 128)

    n_p = _round_up(n, tm)
    f_in_p = _round_up(f_in, tk)
    f_out_p = _round_up(f_out, tn)

    # ---- pad + cast MXU operands (bf16 halves DMA bytes; f32 accumulation) --
    x_p = x
    if (n_p, f_in_p) != (n, f_in):
        x_p = jnp.pad(x, ((0, n_p - n), (0, f_in_p - f_in)))
    x_p = x_p.astype(mxu_dtype)
    w_p = weight
    if (f_out_p, f_in_p) != (f_out, f_in):
        w_p = jnp.pad(weight, ((0, f_out_p - f_out), (0, f_in_p - f_in)))
    w_p = w_p.astype(mxu_dtype)
    g_p = jnp.pad(gamma.astype(jnp.float32), (0, f_out_p - f_out)).reshape(1, f_out_p)
    b_p = jnp.pad(beta.astype(jnp.float32), (0, f_out_p - f_out)).reshape(1, f_out_p)

    vmem_limit = _vmem_limit_bytes()
    mxu_isz = jnp.dtype(mxu_dtype).itemsize
    out_isz = jnp.dtype(out_dtype).itemsize
    fused_bytes = (2 * n_p * tn * out_isz      # resident output slab (double-buffered)
                   + 2 * tm * tk * mxu_isz     # x tiles (double-buffered)
                   + 2 * tn * tk * mxu_isz     # W tiles (double-buffered)
                   + tm * tn * 4               # matmul accumulator
                   + 8 * tn * 4)               # stats scratch + gamma/beta
    if fuse is None:
        fuse = fused_bytes + (4 << 20) <= vmem_limit

    grid = (f_out_p // tn, n_p // tm, f_in_p // tk)   # (j, i, k)

    if fuse:
        out_p = pl.pallas_call(
            functools.partial(_fused_fc_bn_relu_kernel,
                              n_real=float(n), num_row_tiles=n_p // tm),
            out_shape=jax.ShapeDtypeStruct((n_p, f_out_p), out_dtype),
            grid_spec=pltpu.PrefetchScalarGridSpec(
                num_scalar_prefetch=0,
                grid=grid,
                in_specs=[
                    pl.BlockSpec((tm, tk), lambda j, i, k: (i, k)),   # x
                    pl.BlockSpec((tn, tk), lambda j, i, k: (j, k)),   # W [Fout, Fin]
                    pl.BlockSpec((1, tn), lambda j, i, k: (0, j)),    # gamma
                    pl.BlockSpec((1, tn), lambda j, i, k: (0, j)),    # beta
                ],
                out_specs=pl.BlockSpec((n_p, tn), lambda j, i, k: (0, j)),
                scratch_shapes=[
                    pltpu.VMEM((tm, tn), jnp.float32),   # matmul accumulator
                    pltpu.VMEM((1, tn), jnp.float32),    # sum
                    pltpu.VMEM((1, tn), jnp.float32),    # sum of squares
                ],
            ),
            compiler_params=pltpu.CompilerParams(
                dimension_semantics=("parallel", "arbitrary", "arbitrary"),
                vmem_limit_bytes=vmem_limit,
            ),
        )(x_p, w_p, g_p, b_p)
        return out_p[:n, :f_out]

    # ---- fallback: two kernels; y intermediate stored narrow (bf16) ---------
    y_dtype = (jnp.bfloat16 if jnp.dtype(mxu_dtype) == jnp.dtype(jnp.bfloat16)
               else out_dtype)
    y, s, ss = pl.pallas_call(
        _matmul_stats_kernel,
        out_shape=(
            jax.ShapeDtypeStruct((n_p, f_out_p), y_dtype),
            jax.ShapeDtypeStruct((1, f_out_p), jnp.float32),
            jax.ShapeDtypeStruct((1, f_out_p), jnp.float32),
        ),
        grid_spec=pltpu.PrefetchScalarGridSpec(
            num_scalar_prefetch=0,
            grid=grid,
            in_specs=[
                pl.BlockSpec((tm, tk), lambda j, i, k: (i, k)),
                pl.BlockSpec((tn, tk), lambda j, i, k: (j, k)),
            ],
            out_specs=[
                pl.BlockSpec((tm, tn), lambda j, i, k: (i, j)),
                pl.BlockSpec((1, tn), lambda j, i, k: (0, j)),
                pl.BlockSpec((1, tn), lambda j, i, k: (0, j)),
            ],
            scratch_shapes=[pltpu.VMEM((tm, tn), jnp.float32)],
        ),
        compiler_params=pltpu.CompilerParams(
            dimension_semantics=("parallel", "arbitrary", "arbitrary"),
            vmem_limit_bytes=vmem_limit,
        ),
    )(x_p, w_p)

    # Fold BN into per-feature scale/shift once (tiny (1, Fout) math in XLA).
    inv_n = 1.0 / float(n)
    mean = s * inv_n
    var = jnp.maximum(ss * inv_n - mean * mean, 0.0)
    scale = g_p * jax.lax.rsqrt(var + BN_EPS)
    shift = b_p - mean * scale

    out_p = pl.pallas_call(
        _scale_shift_relu_kernel,
        out_shape=jax.ShapeDtypeStruct((n_p, f_out_p), out_dtype),
        grid_spec=pltpu.PrefetchScalarGridSpec(
            num_scalar_prefetch=0,
            grid=(f_out_p // tn, n_p // tm),   # Fout outer: scale/shift stay resident
            in_specs=[
                pl.BlockSpec((tm, tn), lambda j, i: (i, j)),
                pl.BlockSpec((1, tn), lambda j, i: (0, j)),
                pl.BlockSpec((1, tn), lambda j, i: (0, j)),
            ],
            out_specs=pl.BlockSpec((tm, tn), lambda j, i: (i, j)),
        ),
        compiler_params=pltpu.CompilerParams(
            dimension_semantics=("parallel", "parallel"),
            vmem_limit_bytes=vmem_limit,
        ),
    )(y, scale, shift)
    return out_p[:n, :f_out]


def fc_block_ref(x, weight, bias, gamma, beta):
    y = x @ weight.T + bias
    mean = jnp.mean(y, axis=0, keepdims=True)
    var = jnp.mean((y - mean) ** 2, axis=0, keepdims=True)   # biased batch var
    y = (y - mean) / jnp.sqrt(var + BN_EPS) * gamma + beta
    return jnp.maximum(y, 0.0)


if __name__ == "__main__":
    key = jax.random.PRNGKey(0)

    # ---- test 1: small shapes, exact-dtype (f32 MXU), single tile ----------
    N1, FIN1, FOUT1 = 16, 32, 64
    k1, k2, k3, k4, k5, key = jax.random.split(key, 6)
    x1 = jax.random.normal(k1, (N1, FIN1), jnp.float32)
    bound = 1.0 / jnp.sqrt(FIN1)
    w1 = jax.random.uniform(k2, (FOUT1, FIN1), jnp.float32, -bound, bound)
    b1 = jax.random.uniform(k3, (FOUT1,), jnp.float32, -bound, bound)
    g1 = jax.random.uniform(k4, (FOUT1,), jnp.float32, 0.5, 1.5)
    be1 = 0.5 * jax.random.normal(k5, (FOUT1,), jnp.float32)

    out1 = jax.block_until_ready(
        fc_block(x1, w1, b1, g1, be1, mxu_dtype=jnp.float32))
    ref1 = fc_block_ref(x1, w1, b1, g1, be1)
    assert out1.shape == (N1, FOUT1)
    assert jnp.allclose(out1, ref1, atol=1e-4, rtol=1e-4), float(
        jnp.max(jnp.abs(out1 - ref1)))

    # ---- test 2: multi-tile, non-aligned shapes, bf16 MXU, fused path ------
    N2, FIN2, FOUT2 = 200, 160, 224
    k1, k2, k3, k4, k5, key = jax.random.split(key, 6)
    x2 = jax.random.normal(k1, (N2, FIN2), jnp.float32)
    bound = 1.0 / jnp.sqrt(FIN2)
    w2 = jax.random.uniform(k2, (FOUT2, FIN2), jnp.float32, -bound, bound)
    b2 = jax.random.uniform(k3, (FOUT2,), jnp.float32, -bound, bound)
    g2 = jax.random.uniform(k4, (FOUT2,), jnp.float32, 0.5, 1.5)
    be2 = 0.5 * jax.random.normal(k5, (FOUT2,), jnp.float32)

    # Reference on the same bf16-quantized operands the kernel feeds the MXU.
    x2q = x2.astype(jnp.bfloat16).astype(jnp.float32)
    w2q = w2.astype(jnp.bfloat16).astype(jnp.float32)
    ref2 = fc_block_ref(x2q, w2q, b2, g2, be2)

    out2 = jax.block_until_ready(
        fc_block(x2, w2, b2, g2, be2, tm=64, tn=128, tk=128))
    assert out2.shape == (N2, FOUT2)
    assert jnp.allclose(out2, ref2, atol=2e-3, rtol=2e-3), float(
        jnp.max(jnp.abs(out2 - ref2)))

    # ---- test 3: same problem forced through the unfused fallback ----------
    # (y intermediate stored in bf16 -> slightly looser tolerance)
    out3 = jax.block_until_ready(
        fc_block(x2, w2, b2, g2, be2, tm=64, tn=128, tk=128, fuse=False))
    assert out3.shape == (N2, FOUT2)
    assert jnp.allclose(out3, ref2, atol=3e-2, rtol=3e-2), float(
        jnp.max(jnp.abs(out3 - ref2)))

    print("KERNEL_OK")
</pallas_src>

<mosaic_0001>
module attributes {stable_mosaic.version = 11 : i64} {
  func.func @_fused_fc_bn_relu_kernel(%arg0: i32, %arg1: i32, %arg2: i32, %arg3: memref<16x128xf32, #tpu.memory_space<vmem>>, %arg4: memref<128x128xf32, #tpu.memory_space<vmem>>, %arg5: memref<1x128xf32, #tpu.memory_space<vmem>>, %arg6: memref<1x128xf32, #tpu.memory_space<vmem>>, %arg7: memref<16x128xf32, #tpu.memory_space<vmem>>, %arg8: memref<16x128xf32, #tpu.memory_space<vmem>>, %arg9: memref<1x128xf32, #tpu.memory_space<vmem>>, %arg10: memref<1x128xf32, #tpu.memory_space<vmem>>) attributes {dimension_semantics = [#tpu.dimension_semantics<parallel>, #tpu.dimension_semantics<arbitrary>, #tpu.dimension_semantics<arbitrary>], iteration_bounds = array<i64: 1, 1, 1>, scalar_prefetch = 0 : i64, scratch_operands = 3 : i64, tpu.core_type = #tpu.core_type<tc>, window_params = [{transform_indices = @transform_0, window_bounds = array<i64: 16, 128>}, {transform_indices = @transform_1, window_bounds = array<i64: 128, 128>}, {transform_indices = @transform_2, window_bounds = array<i64: 1, 128>}, {transform_indices = @transform_3, window_bounds = array<i64: 1, 128>}, {transform_indices = @transform_4, window_bounds = array<i64: 16, 128>}]} {
    %c0_i32 = arith.constant 0 : i32
    %0 = arith.cmpi eq, %arg2, %c0_i32 : i32
    %1 = arith.extui %0 : i1 to i32
    %c0_i32_0 = arith.constant 0 : i32
    %2 = arith.cmpi ne, %1, %c0_i32_0 : i32
    scf.if %2 {
      %cst_16 = arith.constant 0.000000e+00 : f32
      %22 = vector.broadcast %cst_16 : f32 to vector<16x128xf32>
      %c0_17 = arith.constant 0 : index
      %c0_18 = arith.constant 0 : index
      %23 = vector.load %arg8[%c0_17, %c0_18] : memref<16x128xf32, #tpu.memory_space<vmem>>, vector<16x128xf32>
      tpu.vector_store %arg8[%c0_17, %c0_18], %22 {strides = array<i32>} : memref<16x128xf32, #tpu.memory_space<vmem>>, vector<16x128xf32>,
    } else {
    }
    %c0_i32_1 = arith.constant 0 : i32
    %3 = arith.cmpi eq, %arg1, %c0_i32_1 : i32
    %c0_i32_2 = arith.constant 0 : i32
    %4 = arith.cmpi eq, %arg2, %c0_i32_2 : i32
    %5 = arith.andi %3, %4 : i1
    %6 = arith.extui %5 : i1 to i32
    %c0_i32_3 = arith.constant 0 : i32
    %7 = arith.cmpi ne, %6, %c0_i32_3 : i32
    scf.if %7 {
      %cst_16 = arith.constant 0.000000e+00 : f32
      %22 = vector.broadcast %cst_16 : f32 to vector<1x128xf32>
      %c0_17 = arith.constant 0 : index
      %c0_18 = arith.constant 0 : index
      %23 = vector.load %arg9[%c0_17, %c0_18] : memref<1x128xf32, #tpu.memory_space<vmem>>, vector<1x128xf32>
      tpu.vector_store %arg9[%c0_17, %c0_18], %22 {strides = array<i32>} : memref<1x128xf32, #tpu.memory_space<vmem>>, vector<1x128xf32>,
      %cst_19 = arith.constant 0.000000e+00 : f32
      %24 = vector.broadcast %cst_19 : f32 to vector<1x128xf32>
      %c0_20 = arith.constant 0 : index
      %c0_21 = arith.constant 0 : index
      %25 = vector.load %arg10[%c0_20, %c0_21] : memref<1x128xf32, #tpu.memory_space<vmem>>, vector<1x128xf32>
      tpu.vector_store %arg10[%c0_20, %c0_21], %24 {strides = array<i32>} : memref<1x128xf32, #tpu.memory_space<vmem>>, vector<1x128xf32>,
    } else {
    }
    %c0 = arith.constant 0 : index
    %c0_4 = arith.constant 0 : index
    %8 = vector.load %arg8[%c0, %c0_4] : memref<16x128xf32, #tpu.memory_space<vmem>>, vector<16x128xf32>
    %c0_5 = arith.constant 0 : index
    %c0_6 = arith.constant 0 : index
    %9 = vector.load %arg3[%c0_5, %c0_6] : memref<16x128xf32, #tpu.memory_space<vmem>>, vector<16x128xf32>
    %c0_7 = arith.constant 0 : index
    %c0_8 = arith.constant 0 : index
    %10 = vector.load %arg4[%c0_7, %c0_8] : memref<128x128xf32, #tpu.memory_space<vmem>>, vector<128x128xf32>
    %cst = arith.constant dense<0.000000e+00> : vector<16x128xf32>
    %11 = tpu.matmul %9, %10, %cst {dimension_numbers = #tpu.dot_dimension_numbers<[1], [1], [0], [0], [0, 0, 1, 0], [], []>} : vector<16x128xf32>, vector<128x128xf32>, vector<16x128xf32> -> vector<16x128xf32>
    %12 = arith.addf %8, %11 : vector<16x128xf32>
    %c0_9 = arith.constant 0 : index
    %c0_10 = arith.constant 0 : index
    %13 = vector.load %arg8[%c0_9, %c0_10] : memref<16x128xf32, #tpu.memory_space<vmem>>, vector<16x128xf32>
    tpu.vector_store %arg8[%c0_9, %c0_10], %12 {strides = array<i32>} : memref<16x128xf32, #tpu.memory_space<vmem>>, vector<16x128xf32>,
    %c0_i32_11 = arith.constant 0 : i32
    %14 = arith.cmpi eq, %arg2, %c0_i32_11 : i32
    %15 = arith.extui %14 : i1 to i32
    %c0_i32_12 = arith.constant 0 : i32
    %16 = arith.cmpi ne, %15, %c0_i32_12 : i32
    scf.if %16 {
      %c0_16 = arith.constant 0 : index
      %c0_17 = arith.constant 0 : index
      %22 = vector.load %arg8[%c0_16, %c0_17] : memref<16x128xf32, #tpu.memory_space<vmem>>, vector<16x128xf32>
      %c16_i32 = arith.constant 16 : i32
      %23 = arith.muli %arg1, %c16_i32 : i32
      %24 = tpu.assume_multiple %23, 16 : i32
      %25 = arith.index_cast %24 : i32 to index
      %c0_18 = arith.constant 0 : index
      %26 = vector.load %arg7[%25, %c0_18] : memref<16x128xf32, #tpu.memory_space<vmem>>, vector<16x128xf32>
      tpu.vector_store %arg7[%25, %c0_18], %22 {strides = array<i32>} : memref<16x128xf32, #tpu.memory_space<vmem>>, vector<16x128xf32>,
      %c0_19 = arith.constant 0 : index
      %c0_20 = arith.constant 0 : index
      %27 = vector.load %arg9[%c0_19, %c0_20] : memref<1x128xf32, #tpu.memory_space<vmem>>, vector<1x128xf32>
      %cst_21 = arith.constant dense<0.000000e+00> : vector<128xf32>
      %28 = vector.multi_reduction <add>, %22, %cst_21 [0] : vector<16x128xf32> to vector<128xf32>
      %29 = vector.shape_cast %28 : vector<128xf32> to vector<1x128xf32>
      %30 = arith.addf %27, %29 : vector<1x128xf32>
      %c0_22 = arith.constant 0 : index
      %c0_23 = arith.constant 0 : index
      %31 = vector.load %arg9[%c0_22, %c0_23] : memref<1x128xf32, #tpu.memory_space<vmem>>, vector<1x128xf32>
      tpu.vector_store %arg9[%c0_22, %c0_23], %30 {strides = array<i32>} : memref<1x128xf32, #tpu.memory_space<vmem>>, vector<1x128xf32>,
      %c0_24 = arith.constant 0 : index
      %c0_25 = arith.constant 0 : index
      %32 = vector.load %arg10[%c0_24, %c0_25] : memref<1x128xf32, #tpu.memory_space<vmem>>, vector<1x128xf32>
      %33 = arith.mulf %22, %22 : vector<16x128xf32>
      %cst_26 = arith.constant dense<0.000000e+00> : vector<128xf32>
      %34 = vector.multi_reduction <add>, %33, %cst_26 [0] : vector<16x128xf32> to vector<128xf32>
      %35 = vector.shape_cast %34 : vector<128xf32> to vector<1x128xf32>
      %36 = arith.addf %32, %35 : vector<1x128xf32>
      %c0_27 = arith.constant 0 : index
      %c0_28 = arith.constant 0 : index
      %37 = vector.load %arg10[%c0_27, %c0_28] : memref<1x128xf32, #tpu.memory_space<vmem>>, vector<1x128xf32>
      tpu.vector_store %arg10[%c0_27, %c0_28], %36 {strides = array<i32>} : memref<1x128xf32, #tpu.memory_space<vmem>>, vector<1x128xf32>,
    } else {
    }
    %c0_i32_13 = arith.constant 0 : i32
    %17 = arith.cmpi eq, %arg1, %c0_i32_13 : i32
    %c0_i32_14 = arith.constant 0 : i32
    %18 = arith.cmpi eq, %arg2, %c0_i32_14 : i32
    %19 = arith.andi %17, %18 : i1
    %20 = arith.extui %19 : i1 to i32
    %c0_i32_15 = arith.constant 0 : i32
    %21 = arith.cmpi ne, %20, %c0_i32_15 : i32
    scf.if %21 {
      %c0_16 = arith.constant 0 : index
      %c0_17 = arith.constant 0 : index
      %22 = vector.load %arg9[%c0_16, %c0_17] : memref<1x128xf32, #tpu.memory_space<vmem>>, vector<1x128xf32>
      %cst_18 = arith.constant 6.250000e-02 : f32
      %23 = vector.broadcast %cst_18 : f32 to vector<1x128xf32>
      %24 = arith.mulf %22, %23 : vector<1x128xf32>
      %c0_19 = arith.constant 0 : index
      %c0_20 = arith.constant 0 : index
      %25 = vector.load %arg10[%c0_19, %c0_20] : memref<1x128xf32, #tpu.memory_space<vmem>>, vector<1x128xf32>
      %cst_21 = arith.constant 6.250000e-02 : f32
      %26 = vector.broadcast %cst_21 : f32 to vector<1x128xf32>
      %27 = arith.mulf %25, %26 : vector<1x128xf32>
      %28 = arith.mulf %24, %24 : vector<1x128xf32>
      %29 = arith.subf %27, %28 : vector<1x128xf32>
      %cst_22 = arith.constant 0.000000e+00 : f32
      %30 = vector.broadcast %cst_22 : f32 to vector<1x128xf32>
      %31 = arith.maximumf %29, %30 : vector<1x128xf32>
      %c0_23 = arith.constant 0 : index
      %c0_24 = arith.constant 0 : index
      %32 = vector.load %arg5[%c0_23, %c0_24] : memref<1x128xf32, #tpu.memory_space<vmem>>, vector<1x128xf32>
      %cst_25 = arith.constant 9.99999974E-6 : f32
      %33 = vector.broadcast %cst_25 : f32 to vector<1x128xf32>
      %34 = arith.addf %31, %33 : vector<1x128xf32>
      %35 = math.rsqrt %34 : vector<1x128xf32>
      %36 = arith.mulf %32, %35 : vector<1x128xf32>
      %c0_26 = arith.constant 0 : index
      %c0_27 = arith.constant 0 : index
      %37 = vector.load %arg6[%c0_26, %c0_27] : memref<1x128xf32, #tpu.memory_space<vmem>>, vector<1x128xf32>
      %38 = arith.mulf %24, %36 : vector<1x128xf32>
      %39 = arith.subf %37, %38 : vector<1x128xf32>
      %c0_i32_28 = arith.constant 0 : i32
      %c1_i32 = arith.constant 1 : i32
      %40 = arith.muli %c0_i32_28, %c1_i32 : i32
      %c0_i32_29 = arith.constant 0 : i32
      %41 = arith.addi %c0_i32_29, %40 : i32
      %c16_i32 = arith.constant 16 : i32
      %42 = arith.muli %41, %c16_i32 : i32
      %43 = tpu.assume_multiple %42, 16 : i32
      %44 = arith.index_cast %43 : i32 to index
      %c0_30 = arith.constant 0 : index
      %45 = vector.load %arg7[%44, %c0_30] : memref<16x128xf32, #tpu.memory_space<vmem>>, vector<16x128xf32>
      %46 = vector.broadcast %36 : vector<1x128xf32> to vector<16x128xf32>
      %47 = arith.mulf %45, %46 : vector<16x128xf32>
      %48 = vector.broadcast %39 : vector<1x128xf32> to vector<16x128xf32>
      %49 = arith.addf %47, %48 : vector<16x128xf32>
      %cst_31 = arith.constant 0.000000e+00 : f32
      %50 = vector.broadcast %cst_31 : f32 to vector<16x128xf32>
      %51 = arith.maximumf %49, %50 : vector<16x128xf32>
      %52 = arith.index_cast %43 : i32 to index
      %c0_32 = arith.constant 0 : index
      %53 = vector.load %arg7[%52, %c0_32] : memref<16x128xf32, #tpu.memory_space<vmem>>, vector<16x128xf32>
      tpu.vector_store %arg7[%52, %c0_32], %51 {strides = array<i32>} : memref<16x128xf32, #tpu.memory_space<vmem>>, vector<16x128xf32>,
      %c1_i32_33 = arith.constant 1 : i32
    } else {
    }
    return
  }
  func.func @transform_0(%arg0: i32, %arg1: i32, %arg2: i32) -> (i32, i32) {
    %c0_i32 = arith.constant 0 : i32
    return %arg1, %arg2 : i32, i32
  }
  func.func @transform_1(%arg0: i32, %arg1: i32, %arg2: i32) -> (i32, i32) {
    %c0_i32 = arith.constant 0 : i32
    return %arg0, %arg2 : i32, i32
  }
  func.func @transform_2(%arg0: i32, %arg1: i32, %arg2: i32) -> (i32, i32) {
    %c0_i32 = arith.constant 0 : i32
    %c0_i32_0 = arith.constant 0 : i32
    return %c0_i32, %arg0 : i32, i32
  }
  func.func @transform_3(%arg0: i32, %arg1: i32, %arg2: i32) -> (i32, i32) {
    %c0_i32 = arith.constant 0 : i32
    %c0_i32_0 = arith.constant 0 : i32
    return %c0_i32, %arg0 : i32, i32
  }
  func.func @transform_4(%arg0: i32, %arg1: i32, %arg2: i32) -> (i32, i32) {
    %c0_i32 = arith.constant 0 : i32
    %c0_i32_0 = arith.constant 0 : i32
    return %c0_i32, %arg0 : i32, i32
  }
}

</mosaic_0001>

<bundles_post_ra>
// kernel: tpu_custom_call.1
= control target key start
LH: loop header
LB: loop body
LE: loop exit
PB: predicated region body
PF: predicated region fallthrough
CT: control target
= control target key end

     0   :  { %9 = vsyncpa [#allocation6], 0  ;;  %s492_s0 = inlined_call_operand.hbm [shape: f32[16,128], index: 0, kind: input, shape index: {}]   ;;  %s493_s1 = inlined_call_operand.hbm [shape: f32[128,128], index: 1, kind: input, shape index: {}]   ;;  %s494_s2 = inlined_call_operand.vmem [shape: f32[1,128], index: 2, kind: input, shape index: {}]   ;;  %s495_s3 = inlined_call_operand.vmem [shape: f32[1,128], index: 3, kind: input, shape index: {}]   ;;  %s496_s4 = inlined_call_operand.hbm [shape: f32[16,128], index: 4, kind: output, shape index: {}]  }
   0x1   :  { %10 = vsyncpa [#allocation9], 0 }
   0x2   :  { %11 = vsyncpa [#allocation7], 0  ;;  %s410_s15 = smov [#allocation5]   ;;  %s338_s19 = scalar_lea.hbm %s492_s0, 256 }
   0x3   :  { %s17_s16 = sshll.u32 %s410_s15, 4  ;;  %p339_p0 = scmp.ne.s32.totalorder %s492_s0, %s338_s19  ;;  %s18_s16 = int_to_ptr.vmem [resolvable:$true] %s17_s16 }
   0x4   :  { %p342_p1 = scmp.lt.u32.totalorder %s338_s19, %s492_s0 }
   0x6   :  { %p344_p2 = pnand %p342_p1, %p339_p0 }
   0x8   :  { %347 = shalt.err (!%p344_p2)
}
   0x9   :  { %s348_s24 = scalar_lea.vmem %s18_s16, 256  ;;  %p353_p4 = scmp.lt.s32.totalorder %s18_s16, %s18_s16 }
   0xa   :  { %p349_p3 = scmp.ne.s32.totalorder %s18_s16, %s348_s24  ;;  %p354_p5 = scmp.lt.s32.totalorder %s348_s24, %s348_s24 }
   0xc   :  { %p355_p6 = por %p354_p5, %p353_p4 }
   0xe   :  { %p356_p7 = pnand %p355_p6, %p349_p3 }
  0x10   :  { %359 = shalt.err (!%p356_p7)
}
  0x11   :  { %s411_s25 = smov 128   ;;  %s412_s26 = smov 8  }
  0x12   :  { %23 = dma.hbm_to_vmem [thread:$0]  %s492_s0, 256, %s18_s16, [#allocation6], %s411_s25, %s411_s25, %s412_s26  }
  0x13   :  { %s413_s29 = smov [#allocation8]   ;;  %s360_s7 = scalar_lea.hbm %s493_s1, 2048 }
  0x14   :  { %s29_s30 = sshll.u32 %s413_s29, 4  ;;  %p361_p8 = scmp.ne.s32.totalorder %s493_s1, %s360_s7  ;;  %s30_s30 = int_to_ptr.vmem [resolvable:$true] %s29_s30 }
  0x15   :  { %p364_p9 = scmp.lt.u32.totalorder %s360_s7, %s493_s1 }
  0x17   :  { %p366_p10 = pnand %p364_p9, %p361_p8 }
  0x19   :  { %369 = shalt.err (!%p366_p10)
}
  0x1a   :  { %s370_s12 = scalar_lea.vmem %s30_s30, 2048  ;;  %p375_p12 = scmp.lt.s32.totalorder %s30_s30, %s30_s30 }
  0x1b   :  { %p371_p11 = scmp.ne.s32.totalorder %s30_s30, %s370_s12  ;;  %p376_p13 = scmp.lt.s32.totalorder %s370_s12, %s370_s12 }
  0x1d   :  { %p377_p0 = por %p376_p13, %p375_p12 }
  0x1f   :  { %p378_p1 = pnand %p377_p0, %p371_p11 }
  0x21   :  { %381 = shalt.err (!%p378_p1)
}
  0x22   :  { %35 = dma.hbm_to_vmem [thread:$0]  %s493_s1, 2048, %s30_s30, [#allocation9], %s411_s25, %s411_s25, %s412_s26  }
  0x23   :  { %404 = dma.done.wait [#allocation6], 256  }
  0x24   :  { %405 = vsyncadd [#allocation6], 4294967040 }
  0x25   :  { %406 = dma.done.wait [#allocation9], 2048  }
  0x26   :  { %407 = vsyncadd [#allocation9], 4294965248  ;;  %v63_v0 = vld [vmem:[#allocation8] sm:$0xff]  ;;  %v64_v1 = vld [vmem:[#allocation8 + $0x8] sm:$0xff]  ;;  %v414_v26 = vmov 0.0   ;;  %v208_v57 = vlaneseq  ;;  %s415_s17 = smov [#allocation10]  }
  0x27   :  { %v65_v2 = vld [vmem:[#allocation8 + $0x10] sm:$0xff]  ;;  %v298_v3 = vpack.c.bf16 %v64_v1, %v63_v0  ;;  %v66_v4 = vld [vmem:[#allocation8 + $0x18] sm:$0xff]  ;;  %v67_v7 = vld [vmem:[#allocation8 + $0x20] sm:$0xff]  ;;  %57 = vst [vmem:[#allocation3] sm:$0x1] %v414_v26  ;;  %s232_s18 = sshll.u32 %s415_s17, 4  ;;  %s233_s18 = int_to_ptr.vmem [resolvable:$true] %s232_s18 }
  0x28   :  { %v302_v5 = vpack.c.bf16 %v66_v4, %v65_v2  ;;  %v61_v6 = vld [vmem:[#allocation5] sm:$0xff]  ;;  %v68_v8 = vld [vmem:[#allocation8 + $0x28] sm:$0xff]  ;;  %v70_v11 = vld [vmem:[#allocation8 + $0x38] sm:$0xff]  ;;  %58 = vst [vmem:[#allocation4] sm:$0x1] %v414_v26  ;;  %v209_v58 = vshrl.u32 %v208_v57, 7  ;;  %p387_p3 = scmp.lt.s32.totalorder %s233_s18, %s233_s18 }
  0x29   :  { %299 = vmatprep.subr.bf16.mxu0 %v298_v3  ;;  %295 = vmatprep.mubr.f32.mxu0 %v61_v6  ;;  %v306_v9 = vpack.c.bf16 %v68_v8, %v67_v7  ;;  %v69_v10 = vld [vmem:[#allocation8 + $0x30] sm:$0xff]  ;;  %v71_v13 = vld [vmem:[#allocation8 + $0x40] sm:$0xff]  ;;  %v72_v14 = vld [vmem:[#allocation8 + $0x48] sm:$0xff] }
  0x2a   :  { %301 = vmatpush3.bf16.xpose.msra.mxu0 %v298_v3  ;;  %v310_v12 = vpack.c.bf16 %v70_v11, %v69_v10  ;;  %v314_v15 = vpack.c.bf16 %v72_v14, %v71_v13  ;;  %v73_v16 = vld [vmem:[#allocation8 + $0x50] sm:$0xff]  ;;  %v74_v17 = vld [vmem:[#allocation8 + $0x58] sm:$0xff]  ;;  %v75_v19 = vld [vmem:[#allocation8 + $0x60] sm:$0xff]  ;;  %v210_v60 = vsub.s32 0, %v209_v58 }
  0x2b   :  { %303 = vmatprep.subr.bf16.mxu0 %v302_v5  ;;  %v318_v18 = vpack.c.bf16 %v74_v17, %v73_v16  ;;  %v76_v20 = vld [vmem:[#allocation8 + $0x68] sm:$0xff]  ;;  %v77_v22 = vld [vmem:[#allocation8 + $0x70] sm:$0xff]  ;;  %v78_v23 = vld [vmem:[#allocation8 + $0x78] sm:$0xff] }
  0x2c   :  { %v322_v21 = vpack.c.bf16 %v76_v20, %v75_v19  ;;  %v326_v24 = vpack.c.bf16 %v78_v23, %v77_v22  ;;  %v62_v25 = vld [vmem:[#allocation5 + $0x8] sm:$0xff]  ;;  %v198_v59 = vld [vmem:[%s494_s2] sm:$0x1]  ;;  %s382_s2 = scalar_lea.vmem %s233_s18, 256 }
  0x2d   :  { %v202_v63 = vld [vmem:[%s495_s3] sm:$0x1]  ;;  %p383_p2 = scmp.ne.s32.totalorder %s233_s18, %s382_s2  ;;  %p388_p4 = scmp.lt.s32.totalorder %s382_s2, %s382_s2 }
  0x2e   :  { %v167_v42 = vld [vmem:[#allocation3] sm:$0x1] }
  0x2f   :  { %v177_v45 = vld [vmem:[#allocation4] sm:$0x1]  ;;  %p389_p5 = por %p388_p4, %p387_p3 }
  0x31   :  { %p390_p6 = pnand %p389_p5, %p383_p2 }
  0x32   :  { %305 = vmatpush3.bf16.xpose.msra.mxu0 %v302_v5 }
  0x33   :  { %307 = vmatprep.subr.bf16.mxu0 %v306_v9 }
  0x3a   :  { %309 = vmatpush3.bf16.xpose.msra.mxu0 %v306_v9 }
  0x3b   :  { %311 = vmatprep.subr.bf16.mxu0 %v310_v12 }
  0x42   :  { %313 = vmatpush3.bf16.xpose.msra.mxu0 %v310_v12 }
  0x43   :  { %315 = vmatprep.subr.bf16.mxu0 %v314_v15 }
  0x4a   :  { %317 = vmatpush3.bf16.xpose.msra.mxu0 %v314_v15 }
  0x4b   :  { %319 = vmatprep.subr.bf16.mxu0 %v318_v18 }
  0x52   :  { %321 = vmatpush3.bf16.xpose.msra.mxu0 %v318_v18 }
  0x53   :  { %323 = vmatprep.subr.bf16.mxu0 %v322_v21 }
  0x5a   :  { %325 = vmatpush3.bf16.xpose.msra.mxu0 %v322_v21 }
  0x5b   :  { %327 = vmatprep.subr.bf16.mxu0 %v326_v24 }
  0x62   :  { %329 = vmatpush3.bf16.xpose.msra.mxu0 %v326_v24 }
  0x69   :  { %296 = vmatmul.mubr.f32.vlgmr.msra.gmra.mrb[0].mxu0 %v62_v25 }
 0x13c   :  { %v297_v27 = vpop.f32.mrb[0].mxu0 }
 0x13d   :  { %v179_v28 = vmul.f32 %v297_v27, %v297_v27  ;;  %v145_v29 = vpop.f32.mrb[1].mxu0 }
 0x13e   :  { %v168_v30 = vadd.f32 %v297_v27, %v145_v29  ;;  %v178_v31 = vmul.f32 %v145_v29, %v145_v29 }
 0x140   :  { %v169_v32 = vrot.slane %v168_v30, 4  ;;  %v180_v33 = vadd.f32 %v179_v28, %v178_v31 }
 0x142   :  { %v170_v34 = vadd.f32 %v169_v32, %v168_v30  ;;  %v181_v35 = vrot.slane %v180_v33, 4 }
 0x144   :  { %v171_v36 = vrot.slane %v170_v34, 2  ;;  %v182_v37 = vadd.f32 %v181_v35, %v180_v33 }
 0x146   :  { %v172_v38 = vadd.f32 %v171_v36, %v170_v34  ;;  %v183_v39 = vrot.slane %v182_v37, 2 }
 0x148   :  { %v173_v40 = vrot.slane %v172_v38, 1  ;;  %v184_v41 = vadd.f32 %v183_v39, %v182_v37 }
 0x14a   :  { %v174_v43 = vadd.f32 %v173_v40, %v172_v38  ;;  %v185_v44 = vrot.slane %v184_v41, 1 }
 0x14c   :  { %v175_v46 = vadd.f32 %v174_v43, %v167_v42  ;;  %v186_v47 = vadd.f32 %v185_v44, %v184_v41 }
 0x14e   :  { %176 = vst [vmem:[#allocation3] sm:$0x1] %v175_v46  ;;  %v187_v48 = vadd.f32 %v186_v47, %v177_v45 }
 0x150   :  { %188 = vst [vmem:[#allocation4] sm:$0x1] %v187_v48 }
 0x155   :  { %v191_v49 = vld [vmem:[#allocation3] sm:$0x1] }
 0x156   :  { %v192_v50 = vmul.f32 0.0625, %v191_v49 }
 0x157   :  { %v193_v51 = vld [vmem:[#allocation4] sm:$0x1] }
 0x158   :  { %v194_v52 = vmul.f32 0.0625, %v193_v51  ;;  %v195_v53 = vmul.f32 %v192_v50, %v192_v50 }
 0x15a   :  { %v196_v54 = vsub.f32 %v194_v52, %v195_v53 }
 0x15c   :  { %v197_v55 = vmax.f32 %v196_v54, 0.0 }
 0x15e   :  { %v199_v56 = vadd.f32 1e-05, %v197_v55 }
 0x160   :  { %336 = vrsqrt.f32 %v199_v56 }
 0x16a   :  { %v337_v61 = vpop.eup %336 }
 0x16b   :  { %v201_v62 = vmul.f32 %v337_v61, %v198_v59 }
 0x16d   :  { %v203_v0 = vmul.f32 %v201_v62, %v192_v50  ;;  %v211_v1 = vrot.slane %v201_v62, %v210_v60 }
 0x16f   :  { %v204_v2 = vsub.f32 %v202_v63, %v203_v0  ;;  %v213_v3 = vmul.f32 %v211_v1, %v145_v29  ;;  %v214_v4 = vmul.f32 %v297_v27, %v211_v1 }
 0x171   :  { %v219_v5 = vrot.slane %v204_v2, %v210_v60 }
 0x173   :  { %v221_v6 = vadd.f32 %v219_v5, %v213_v3  ;;  %v222_v7 = vadd.f32 %v219_v5, %v214_v4 }
 0x175   :  { %v223_v8 = vmax.f32 %v221_v6, 0.0  ;;  %v224_v9 = vmax.f32 %v222_v7, 0.0 }
 0x177   :  { %225 = vst [vmem:[#allocation10] sm:$0xff] %v223_v8  ;;  %226 = vst [vmem:[#allocation10 + $0x8] sm:$0xff] %v224_v9 }
 0x178   :  { %393 = shalt.err (!%p390_p6)
}
 0x179   :  { %s394_s20 = scalar_lea.hbm %s496_s4, 256 }
 0x17a   :  { %p395_p7 = scmp.ne.s32.totalorder %s496_s4, %s394_s20  ;;  %p398_p8 = scmp.lt.u32.totalorder %s394_s20, %s496_s4 }
 0x17c   :  { %p400_p9 = pnand %p398_p8, %p395_p7 }
 0x17e   :  { %403 = shalt.err (!%p400_p9)
}
 0x17f   :  { %238 = dma.vmem_to_hbm [thread:$0]  %s233_s18, 256, %s496_s4, [#allocation7], %s411_s25, %s411_s25, %s412_s26  }
 0x180   :  { %408 = dma.done.wait [#allocation7], 256  }
 0x181   :  { %409 = vsyncadd [#allocation7], 4294967040 }
 0x182   :  { %242 = vsyncpa [#allocation6], 1 }
 0x183   :  { %243 = vsyncpa [#allocation9], 1 }
 0x184   :  { %244 = vsyncpa [#allocation7], 1 }

</bundles_post_ra>
